<compile_context>
chip_gen: v6e
topology: v6e:2x2x1
jax: 0.10.0
libtpu: 0.0.40
codegen_flags: <defaults>
</compile_context>

<pallas_src>
import functools

import numpy as np
import jax
import jax.numpy as jnp
from jax import lax
from jax.experimental import pallas as pl
from jax.experimental.pallas import tpu as pltpu


def _default_elementwise_dtype():
    """bf16 elementwise chain on v6e and newer; f32 on v5e and older (no bf16 VPU/EUP)."""
    try:
        kind = jax.devices()[0].device_kind.lower()
    except Exception:
        return jnp.float32
    for old in ("v2", "v3", "v4", "v5"):
        if old in kind:
            return jnp.float32
    if "tpu" in kind:
        return jnp.bfloat16
    return jnp.float32


def _rowsum_exp_sigmoid_kernel(zr_ref, zc_ref, o_ref, acc_ref, *,
                               n_total, tile_n, tile_c, acc_lanes,
                               elementwise_dtype, needs_col_mask):
    """Accumulates per_row_sum[r] = sum_c exp(sigmoid(<z_r, z_c>)) over column tiles."""
    j = pl.program_id(1)                      # column tile (innermost reduction)
    last_j = pl.num_programs(1) - 1

    @pl.when(j == 0)
    def _init():
        acc_ref[...] = jnp.zeros_like(acc_ref)

    # scores[r, c] = <z_r, z_c> / T   (1/T already folded into operands as 1/sqrt(T)).
    scores = lax.dot_general(zr_ref[...], zc_ref[...], (((1,), (1,)), ((), ())),
                             preferred_element_type=jnp.float32)

    x = scores.astype(elementwise_dtype)
    # Sigmoid via a single tanh (1 EUP op) instead of exp + divide.
    s = jnp.tanh(x * 0.5) * 0.5 + 0.5
    # s in (0, 1): plain exp is stable.  Accumulate in f32.
    e = jnp.exp(s).astype(jnp.float32)

    def accumulate(vals):
        # Lane-dense partial reduction (tile_n, tile_c) -> (tile_n, acc_lanes) using
        # only 128-lane-aligned slices + VPU adds; no per-step cross-lane XLU work.
        part = vals[:, :acc_lanes]
        for kk in range(1, tile_c // acc_lanes):
            part = part + vals[:, kk * acc_lanes:(kk + 1) * acc_lanes]
        acc_ref[...] += part

    if needs_col_mask:
        # Only the last column tile can contain columns >= N; mask only there.
        @pl.when(j != last_j)
        def _interior():
            accumulate(e)

        @pl.when(j == last_j)
        def _boundary():
            c = j * tile_c + lax.broadcasted_iota(jnp.int32, (tile_n, tile_c), 1)
            accumulate(jnp.where(c < n_total, e, 0.0))
    else:
        accumulate(e)

    @pl.when(j == last_j)
    def _finalize():
        # Single cross-lane reduction per row tile.
        o_ref[...] = jnp.sum(acc_ref[...], axis=1, keepdims=True)


def instance_loss(z_i, z_j, temperature, *, tile_n=None, tile_c=None,
                  matmul_dtype=jnp.bfloat16, elementwise_dtype=None):
    """Pallas TPU implementation of InstanceLoss.forward; returns the scalar loss."""
    batch_size, d = z_i.shape
    n = 2 * batch_size

    zf = jnp.concatenate([z_i, z_j], axis=0).astype(jnp.float32)        # [N, D]
    inv_t = 1.0 / jnp.asarray(temperature, jnp.float32)

    # O(N*D) math hoisted out of the streamed O(N^2) kernel (f32, wrapper-side):
    #   positive logit pos[r] = sim[r, pair(r)] = sigmoid(<z_i[b], z_j[b]>/T)
    #   diagonal term diag[r] = sim[r, r]       = sigmoid(||z_r||^2 / T)
    pos_half = jax.nn.sigmoid(
        jnp.sum(z_i.astype(jnp.float32) * z_j.astype(jnp.float32), axis=-1) * inv_t)
    pos = jnp.concatenate([pos_half, pos_half], axis=0)                 # [N]
    diag = jax.nn.sigmoid(jnp.sum(zf * zf, axis=-1) * inv_t)            # [N]

    # Fold 1/T into the MXU operands: (z/sqrt(T)) @ (z/sqrt(T)).T == (z @ z.T)/T.
    z_mm = (zf * jnp.sqrt(inv_t)).astype(matmul_dtype)

    if elementwise_dtype is None:
        elementwise_dtype = _default_elementwise_dtype()

    # ---- tile selection ----
    if tile_c is None:
        tile_c = min(n, 2048) if n % 128 == 0 else n
    if tile_n is None:
        if n <= 16:
            tile_n = n
        elif n > 512:
            tile_n = 256
        else:
            # Ensure >= 2 row tiles so the "parallel" axis shards across v7x's 2 TCs.
            tile_n = max(8, ((n // 2) // 8) * 8)
    assert tile_n == n or tile_n % 8 == 0, tile_n
    assert tile_c == n or tile_c % 8 == 0, tile_c

    acc_lanes = 128 if tile_c % 128 == 0 else tile_c
    needs_col_mask = (n % tile_c) != 0
    grid = (pl.cdiv(n, tile_n), pl.cdiv(n, tile_c))

    # Raise scoped VMEM above the (16 MiB v5e / 32 MiB v6e,v7x) default when tiles are
    # large; cap at 64 MiB (v7x physical VMEM per TC).
    item = np.dtype(matmul_dtype).itemsize
    est = (2 * 2 * (tile_n + tile_c) * d * item          # double-buffered z blocks
           + 6 * tile_n * tile_c * 4                     # score/sigmoid/exp temporaries
           + tile_n * acc_lanes * 4 + tile_n * 8)        # accumulator + output
    vmem_limit = int(min(64 * 1024 * 1024, max(32 * 1024 * 1024, 2 * est)))

    kernel = functools.partial(
        _rowsum_exp_sigmoid_kernel,
        n_total=n, tile_n=tile_n, tile_c=tile_c, acc_lanes=acc_lanes,
        elementwise_dtype=elementwise_dtype, needs_col_mask=needs_col_mask)

    per_row_sum = pl.pallas_call(
        kernel,
        out_shape=jax.ShapeDtypeStruct((n, 1), jnp.float32),
        grid=grid,
        in_specs=[
            pl.BlockSpec((tile_n, d), lambda i, j: (i, 0)),   # query rows (resident over j)
            pl.BlockSpec((tile_c, d), lambda i, j: (j, 0)),   # key rows (reduction axis)
        ],
        # Constant block index across j -> output/accumulator resident during reduction.
        out_specs=pl.BlockSpec((tile_n, 1), lambda i, j: (i, 0)),
        scratch_shapes=[pltpu.VMEM((tile_n, acc_lanes), jnp.float32)],
        compiler_params=pltpu.CompilerParams(
            dimension_semantics=("parallel", "arbitrary"),
            vmem_limit_bytes=vmem_limit),
    )(z_mm, z_mm)

    # Denominator for CE with label 0: sum over c != r of exp(sim[r, c]).
    denom = per_row_sum[:, 0] - jnp.exp(diag)
    # TODO(synk): the original torch forward computes `loss /= N` but never returns it;
    # we return the scalar loss (the clear intent).
    return jnp.sum(jnp.log(denom) - pos) / n


def _reference_instance_loss(z_i, z_j, temperature):
    """Literal numpy transcription of the PyTorch forward (float64)."""
    z_i = np.asarray(z_i, dtype=np.float64)
    z_j = np.asarray(z_j, dtype=np.float64)
    b = z_i.shape[0]
    n = 2 * b
    z = np.concatenate([z_i, z_j], axis=0)
    sim = 1.0 / (1.0 + np.exp(-(z @ z.T) / temperature))
    sim_i_j = np.diag(sim, k=b)
    sim_j_i = np.diag(sim, k=-b)
    positive = np.concatenate([sim_i_j, sim_j_i]).reshape(n, 1)
    mask = np.ones((n, n), dtype=bool)
    np.fill_diagonal(mask, False)
    for i in range(b):
        mask[i, b + i] = False
        mask[b + i, i] = False
    negative = sim[mask].reshape(n, -1)
    logits = np.concatenate([positive, negative], axis=1)
    lse = np.log(np.sum(np.exp(logits), axis=1))          # labels are all 0
    return float(np.sum(lse - logits[:, 0]) / n)


if __name__ == "__main__":
    batch_size, d = 16, 32
    temperature = 0.5

    key = jax.random.PRNGKey(0)
    ki, kj = jax.random.split(key)
    z_i = jax.random.normal(ki, (batch_size, d), jnp.float32)
    z_j = jax.random.normal(kj, (batch_size, d), jnp.float32)

    ref = _reference_instance_loss(z_i, z_j, temperature)

    # 1) Strict f32 check.  tile_c=24 does not divide N=32, so the multi-column-tile
    #    path WITH last-tile padded-column masking is exercised (2 x 2 grid).
    loss_f32 = instance_loss(z_i, z_j, temperature, tile_n=16, tile_c=24,
                             matmul_dtype=jnp.float32,
                             elementwise_dtype=jnp.float32)
    loss_f32 = jax.block_until_ready(loss_f32)
    assert loss_f32.shape == ()
    assert np.isfinite(float(loss_f32))
    assert abs(float(loss_f32) - ref) <= 1e-4 + 1e-4 * abs(ref), (float(loss_f32), ref)

    # 2) Default performance configuration: bf16 MXU inputs, bf16 elementwise chain on
    #    v6e+/v7x (f32 on v5e), default tiles.  Looser tolerance for bf16.
    loss_perf = instance_loss(z_i, z_j, temperature)
    loss_perf = jax.block_until_ready(loss_perf)
    assert loss_perf.shape == ()
    assert np.isfinite(float(loss_perf))
    assert abs(float(loss_perf) - ref) <= 2e-2 + 1e-2 * abs(ref), (float(loss_perf), ref)

    print("KERNEL_OK")
</pallas_src>

<mosaic_0001>
module attributes {stable_mosaic.version = 11 : i64} {
  func.func @_rowsum_exp_sigmoid_kernel(%arg0: i32, %arg1: i32, %arg2: memref<16x32xf32, #tpu.memory_space<vmem>>, %arg3: memref<24x32xf32, #tpu.memory_space<vmem>>, %arg4: memref<16x1xf32, #tpu.memory_space<vmem>>, %arg5: memref<16x24xf32, #tpu.memory_space<vmem>>) attributes {dimension_semantics = [#tpu.dimension_semantics<parallel>, #tpu.dimension_semantics<arbitrary>], iteration_bounds = array<i64: 2, 2>, scalar_prefetch = 0 : i64, scratch_operands = 1 : i64, tpu.core_type = #tpu.core_type<tc>, window_params = [{transform_indices = @transform_0, window_bounds = array<i64: 16, 32>}, {transform_indices = @transform_1, window_bounds = array<i64: 24, 32>}, {transform_indices = @transform_2, window_bounds = array<i64: 16, 1>}]} {
    %c0_i32 = arith.constant 0 : i32
    %0 = arith.cmpi eq, %arg1, %c0_i32 : i32
    %1 = arith.extui %0 : i1 to i32
    %c0_i32_0 = arith.constant 0 : i32
    %2 = arith.cmpi ne, %1, %c0_i32_0 : i32
    scf.if %2 {
      %cst_12 = arith.constant 0.000000e+00 : f32
      %23 = vector.broadcast %cst_12 : f32 to vector<16x24xf32>
      %c0_13 = arith.constant 0 : index
      %c0_14 = arith.constant 0 : index
      %24 = vector.load %arg5[%c0_13, %c0_14] : memref<16x24xf32, #tpu.memory_space<vmem>>, vector<16x24xf32>
      tpu.vector_store %arg5[%c0_13, %c0_14], %23 {strides = array<i32>} : memref<16x24xf32, #tpu.memory_space<vmem>>, vector<16x24xf32>,
    } else {
    }
    %c0 = arith.constant 0 : index
    %c0_1 = arith.constant 0 : index
    %3 = vector.load %arg2[%c0, %c0_1] : memref<16x32xf32, #tpu.memory_space<vmem>>, vector<16x32xf32>
    %c0_2 = arith.constant 0 : index
    %c0_3 = arith.constant 0 : index
    %4 = vector.load %arg3[%c0_2, %c0_3] : memref<24x32xf32, #tpu.memory_space<vmem>>, vector<24x32xf32>
    %cst = arith.constant dense<0.000000e+00> : vector<16x24xf32>
    %5 = tpu.matmul %3, %4, %cst {dimension_numbers = #tpu.dot_dimension_numbers<[1], [1], [0], [0], [0, 0, 1, 0], [], []>} : vector<16x32xf32>, vector<24x32xf32>, vector<16x24xf32> -> vector<16x24xf32>
    %cst_4 = arith.constant 5.000000e-01 : f32
    %6 = vector.broadcast %cst_4 : f32 to vector<16x24xf32>
    %7 = arith.mulf %5, %6 : vector<16x24xf32>
    %8 = math.tanh %7 : vector<16x24xf32>
    %cst_5 = arith.constant 5.000000e-01 : f32
    %9 = vector.broadcast %cst_5 : f32 to vector<16x24xf32>
    %10 = arith.mulf %8, %9 : vector<16x24xf32>
    %cst_6 = arith.constant 5.000000e-01 : f32
    %11 = vector.broadcast %cst_6 : f32 to vector<16x24xf32>
    %12 = arith.addf %10, %11 : vector<16x24xf32>
    %13 = math.exp %12 : vector<16x24xf32>
    %c1_i32 = arith.constant 1 : i32
    %14 = arith.cmpi ne, %arg1, %c1_i32 : i32
    %15 = arith.extui %14 : i1 to i32
    %c0_i32_7 = arith.constant 0 : i32
    %16 = arith.cmpi ne, %15, %c0_i32_7 : i32
    scf.if %16 {
      %c0_12 = arith.constant 0 : index
      %c0_13 = arith.constant 0 : index
      %23 = vector.load %arg5[%c0_12, %c0_13] : memref<16x24xf32, #tpu.memory_space<vmem>>, vector<16x24xf32>
      %24 = arith.addf %23, %13 : vector<16x24xf32>
      %c0_14 = arith.constant 0 : index
      %c0_15 = arith.constant 0 : index
      %25 = vector.load %arg5[%c0_14, %c0_15] : memref<16x24xf32, #tpu.memory_space<vmem>>, vector<16x24xf32>
      tpu.vector_store %arg5[%c0_14, %c0_15], %24 {strides = array<i32>} : memref<16x24xf32, #tpu.memory_space<vmem>>, vector<16x24xf32>,
    } else {
    }
    %c1_i32_8 = arith.constant 1 : i32
    %17 = arith.cmpi eq, %arg1, %c1_i32_8 : i32
    %18 = arith.extui %17 : i1 to i32
    %c0_i32_9 = arith.constant 0 : i32
    %19 = arith.cmpi ne, %18, %c0_i32_9 : i32
    scf.if %19 {
      %c24_i32 = arith.constant 24 : i32
      %23 = arith.muli %arg1, %c24_i32 : i32
      %24 = tpu.iota {dimensions = array<i32: 1>} : vector<16x24xi32>
      %25 = vector.broadcast %23 : i32 to vector<16x24xi32>
      %26 = arith.addi %25, %24 : vector<16x24xi32>
      %c32_i32 = arith.constant 32 : i32
      %27 = vector.broadcast %c32_i32 : i32 to vector<16x24xi32>
      %28 = arith.cmpi slt, %26, %27 : vector<16x24xi32>
      %cst_12 = arith.constant 0.000000e+00 : f32
      %29 = vector.broadcast %cst_12 : f32 to vector<16x24xf32>
      %30 = arith.select %28, %13, %29 : vector<16x24xi1>, vector<16x24xf32>
      %c0_13 = arith.constant 0 : index
      %c0_14 = arith.constant 0 : index
      %31 = vector.load %arg5[%c0_13, %c0_14] : memref<16x24xf32, #tpu.memory_space<vmem>>, vector<16x24xf32>
      %32 = arith.addf %31, %30 : vector<16x24xf32>
      %c0_15 = arith.constant 0 : index
      %c0_16 = arith.constant 0 : index
      %33 = vector.load %arg5[%c0_15, %c0_16] : memref<16x24xf32, #tpu.memory_space<vmem>>, vector<16x24xf32>
      tpu.vector_store %arg5[%c0_15, %c0_16], %32 {strides = array<i32>} : memref<16x24xf32, #tpu.memory_space<vmem>>, vector<16x24xf32>,
    } else {
    }
    %c1_i32_10 = arith.constant 1 : i32
    %20 = arith.cmpi eq, %arg1, %c1_i32_10 : i32
    %21 = arith.extui %20 : i1 to i32
    %c0_i32_11 = arith.constant 0 : i32
    %22 = arith.cmpi ne, %21, %c0_i32_11 : i32
    scf.if %22 {
      %c0_12 = arith.constant 0 : index
      %c0_13 = arith.constant 0 : index
      %23 = vector.load %arg5[%c0_12, %c0_13] : memref<16x24xf32, #tpu.memory_space<vmem>>, vector<16x24xf32>
      %cst_14 = arith.constant dense<0.000000e+00> : vector<16xf32>
      %24 = vector.multi_reduction <add>, %23, %cst_14 [1] : vector<16x24xf32> to vector<16xf32>
      %25 = vector.shape_cast %24 : vector<16xf32> to vector<16x1xf32>
      %c0_15 = arith.constant 0 : index
      %c0_16 = arith.constant 0 : index
      %26 = vector.load %arg4[%c0_15, %c0_16] : memref<16x1xf32, #tpu.memory_space<vmem>>, vector<16x1xf32>
      tpu.vector_store %arg4[%c0_15, %c0_16], %25 {strides = array<i32>} : memref<16x1xf32, #tpu.memory_space<vmem>>, vector<16x1xf32>,
    } else {
    }
    return
  }
  func.func @transform_0(%arg0: i32, %arg1: i32) -> (i32, i32) {
    %c0_i32 = arith.constant 0 : i32
    %c0_i32_0 = arith.constant 0 : i32
    return %arg0, %c0_i32 : i32, i32
  }
  func.func @transform_1(%arg0: i32, %arg1: i32) -> (i32, i32) {
    %c0_i32 = arith.constant 0 : i32
    %c0_i32_0 = arith.constant 0 : i32
    return %arg1, %c0_i32 : i32, i32
  }
  func.func @transform_2(%arg0: i32, %arg1: i32) -> (i32, i32) {
    %c0_i32 = arith.constant 0 : i32
    %c0_i32_0 = arith.constant 0 : i32
    return %arg0, %c0_i32 : i32, i32
  }
}

</mosaic_0001>

<bundles_post_ra>
// kernel: tpu_custom_call.1
= control target key start
LH: loop header
LB: loop body
LE: loop exit
PB: predicated region body
PF: predicated region fallthrough
CT: control target
= control target key end

     0   :  { %7 = vsyncpa [#allocation4], 0  ;;  %s1027_s0 = inlined_call_operand.hbm [shape: f32[32,32], index: 0, kind: input, shape index: {}]   ;;  %s1028_s1 = inlined_call_operand.hbm [shape: f32[32,32], index: 1, kind: input, shape index: {}]   ;;  %s1029_s2 = inlined_call_operand.vmem [shape: f32[32,1], index: 2, kind: output, shape index: {}]  }
   0x1   :  { %9 = vsyncpa [#allocation4 + $0x1], 0 }
   0x2   :  { %10 = vsyncpa [#allocation6], 0 }
   0x3   :  { %12 = vsyncpa [#allocation6 + $0x1], 0  ;;  %s805_s9 = smov 0   ;;  %s807_s10 = smov 0  }
   0x4   :  { %s809_s11 = smov 0   ;;  %s811_s12 = smov 0  }
   0x5   :  { %s813_s13 = smov 0   ;;  %s815_s14 = smov 0  }
   0x6   :  { %s817_s15 = smov 0   ;;  %s819_s16 = smov 0  }
   0x7   :  { %s821_s17 = smov 0   ;;  %s823_s18 = smov 0  }
   0x8   :  { %s825_s19 = smov 0  }
   0x9 LB: > { %s487_s20 = sadd.s32 4294967295, %s781_s19   ;;  %s27_s21 = sadd.s32 1, %s773_s17  ;;  %s781_s19 = sphi %s825_s19, %s18_s19   ;;  %s777_s18 = sphi %s823_s18, %s1050_s18   ;;  %s773_s17 = sphi %s821_s17, %s1049_s17   ;;  %s769_s16 = sphi %s819_s16, %s1048_s16   ;;  %s765_s15 = sphi %s817_s15, %s1047_s15   ;;  %s761_s14 = sphi %s815_s14, %s1046_s14   ;;  %s757_s13 = sphi %s813_s13, %s1045_s13   ;;  %s753_s12 = sphi %s811_s12, %s1044_s12   ;;  %s749_s11 = sphi %s809_s11, %s1043_s11   ;;  %s745_s10 = sphi %s807_s10, %s1042_s10   ;;  %s741_s9 = sphi %s805_s9, %s1041_s9  }
   0xa   : > { %p28_p0 = scmp.ge.s32.totalorder %s27_s21, 2  ;;  %s30_s22 = sadd.s32 1, %s777_s18 }
   0xb   : > { %s37_s23 = sadd.s32 1, %s761_s14  ;;  %p44_p1 = scmp.ne.s32.totalorder %s761_s14, %s757_s13 }
   0xc   : > { %s1052_s21 = smov (%p28_p0, %s27_s21), 0  ;;  %s1054_s22 = smov (!%p28_p0, %s30_s22), %s777_s18 }
   0xd   : > { %1032 = sst [smem:[#allocation9_spill]] %s1052_s21  ;;  %p45_p2 = scmp.eq.s32.totalorder %s781_s19, 0 }
   0xe   : > { %p50_p3 = scmp.ne.s32.totalorder %s757_s13, %s753_s12  ;;  %p32_p4 = scmp.ge.s32.totalorder %s1054_s22, 2 }
   0xf   : > { %p869_p5 = scmp.eq.s32.totalorder %s487_s20, 0  ;;  %p875_p6 = por %p45_p2, %p44_p1 }
  0x10   : > { %s60_s26 = ssub.s32 %s773_s17, %s1052_s21  ;;  %s1056_s22 = smov (%p32_p4, %s1054_s22), 0 }
  0x11   : > { %1035 = sst [smem:[#allocation10_spill]] %s1056_s22  ;;  %p885_p7 = por %p869_p5, %p50_p3 }
  0x12   : > { %p61_p8 = scmp.eq.s32.totalorder %s60_s26, 0  ;;  %s34_s28 = ssub.s32 %s777_s18, %s1056_s22 }
  0x13   : > { %s63_s29 = sadd.s32 1, %s749_s11  ;;  %p35_p9 = scmp.eq.s32.totalorder %s34_s28, 0 }
  0x14   : > { %p70_p10 = scmp.ne.s32.totalorder %s749_s11, %s745_s10  ;;  %p76_p12 = scmp.ne.s32.totalorder %s745_s10, %s741_s9 }
  0x15   : > { %s895_s30 = scalar_select %p61_p8, %s749_s11, %s63_s29  }
  0x16   : > { %s898_s3 = scalar_select %p35_p9, %s761_s14, %s37_s23  }
  0x17   : > { %p902_p11 = por %p70_p10, %p45_p2  ;;  %p910_p13 = por %p76_p12, %p869_p5 }
  0x18   : > { %p490_p0 = scmp.ge.s32.totalorder %s781_s19, 4 }
  0x19   : > { %s126_s6 = sand.u32 (!%p490_p0), 1, %s761_s14   ;;  %s513_s7 = sshll.u32 (!%p490_p0), %s777_s18, 8 }
  0x1a   : > { %122 = sbr.rel (%p490_p0) target bundleno = 75 (0x4b), region = 16  ;;  %s491_s8 = sshll.u32 (!%p490_p0), %s126_s6, 4 }
  0x1b   : > { %s136_s23 = scalar_lea.hbm (!%p490_p0), %s1027_s0, %s513_s7  ;;  %s130_s26 = scalar_lea.vmem (!%p490_p0), [#allocation3], %s491_s8 }
  0x1c   : > { %s137_s9 = sshll.u32 (!%p490_p0), %s130_s26, 4  ;;  %s127_s24 = scalar_lea.sflag (!%p490_p0), [#allocation4], %s126_s6  ;;  %s138_s9 = int_to_ptr.vmem [resolvable:$true] %s137_s9 }
  0x1d   : > { %s647_s28 = scalar_lea.vmem (!%p490_p0), %s138_s9, 256  ;;  %s783_s29 = smov (!%p490_p0), [#allocation3]  }
  0x1e   : > { %p648_p1 = scmp.ne.s32.totalorder (!%p490_p0), %s138_s9, %s647_s28  ;;  %s651_s22 = sshll.u32 (!%p490_p0), %s783_s29, 4  ;;  %s652_s22 = int_to_ptr.vmem [resolvable:$false] %s651_s22 }
  0x1f   : > { %s653_s21 = scalar_lea.vmem %s652_s22, 512  ;;  %p654_p4 = scmp.lt.s32.totalorder %s138_s9, %s652_s22 }
  0x20   : > { %p649_p2 = pnand %p648_p1, %p875_p6  ;;  %p655_p5 = scmp.lt.s32.totalorder %s653_s21, %s647_s28 }
  0x22   : > { %p650_p3 = pneg %p649_p2  ;;  %p656_p8 = por %p655_p5, %p654_p4 }
  0x24   : > { %p657_p9 = pnand %p656_p8, %p650_p3 }
  0x26   : > { %660 = shalt.err (!%p657_p9)
}
  0x27   : > { %s784_s12 = smov 128   ;;  %s785_s7 = smov 8  }
  0x28   : > { %531 = dma.hbm_to_vmem [thread:$0]  (%p875_p6), %s136_s23, 256, %s138_s9, %s127_s24, %s784_s12, %s784_s12, %s785_s7  }
  0x29   : > { %146 = sbr.rel (!%p902_p11) target bundleno = 75 (0x4b), region = 24  ;;  %s147_s6 = sand.u32 (%p902_p11), 1, %s749_s11  }
  0x2a   : > { %s152_s8 = smul.u32 (%p902_p11), 3, %s773_s17  ;;  %s931_s28 = scalar_lea.sflag (%p902_p11), [#allocation6], %s147_s6 }
  0x2b   : > { %s529_s20 = smul.u32 (%p902_p11), 24, %s147_s6 }
  0x2c   : > { %s153_s26 = ssub.s32 (%p902_p11), 4, %s152_s8 }
  0x2d   : > { %p154_p10 = scmp.lt.s32.totalorder (%p902_p11), %s153_s26, 3  ;;  %s151_s25 = scalar_lea.vmem (%p902_p11), [#allocation5], %s529_s20 }
  0x2f   : > { %s1058_s26 = smov (!%p154_p10, %s153_s26), 3 }
  0x30   : > { %s928_s21 = sshll.u32 %s1058_s26, 7 }
  0x31   : > { %s158_s22 = ssub.s32 384, %s928_s21 }
  0x32   : > { %159 = vsyncadd %s931_s28, %s158_s22  ;;  %p495_p6 = scmp.ne.s32.totalorder %s928_s21, 0  ;;  %s514_s4 = smul.u32 384, %s773_s17 }
  0x33   : > { %s164_s23 = sshll.u32 %s151_s25, 4  ;;  %s665_s8 = scalar_lea.hbm %s1028_s1, 512  ;;  %s941_s23 = int_to_ptr.vmem [resolvable:$true] %s164_s23 }
  0x34   : > { %s939_s29 = scalar_lea.hbm %s1028_s1, %s514_s4 }
  0x35   : > { %s661_s12 = scalar_lea.hbm %s939_s29, %s928_s21 }
  0x36   : > { %p662_p11 = scmp.ne.s32.totalorder %s939_s29, %s661_s12  ;;  %p667_p1 = scmp.lt.s32.totalorder %s665_s8, %s661_s12 }
  0x38   : > { %p663_p12 = pnand %p662_p11, %p495_p6 }
  0x3a   : > { %p664_p0 = pneg %p663_p12 }
  0x3c   : > { %p669_p2 = pnand %p667_p1, %p664_p0 }
  0x3e   : > { %672 = shalt.err (!%p669_p2)
}
  0x3f   : > { %s673_s20 = scalar_lea.vmem %s941_s23, %s928_s21  ;;  %s786_s26 = smov [#allocation5]  }
  0x40   : > { %p674_p3 = scmp.ne.s32.totalorder %s941_s23, %s673_s20  ;;  %s677_s22 = sshll.u32 %s786_s26, 4  ;;  %s678_s22 = int_to_ptr.vmem [resolvable:$false] %s677_s22 }
  0x41   : > { %s679_s25 = scalar_lea.vmem %s678_s22, 768  ;;  %p680_p8 = scmp.lt.s32.totalorder %s941_s23, %s678_s22 }
  0x42   : > { %p675_p4 = pnand %p674_p3, %p495_p6  ;;  %p681_p9 = scmp.lt.s32.totalorder %s679_s25, %s673_s20 }
  0x44   : > { %p676_p5 = pneg %p675_p4  ;;  %p682_p10 = por %p681_p9, %p680_p8 }
  0x46   : > { %p683_p11 = pnand %p682_p10, %p676_p5 }
  0x48   : > { %686 = shalt.err (!%p683_p11)
}
  0x49   : > { %s787_s4 = smov 128   ;;  %s788_s9 = smov 8  }
  0x4a   : > { %170 = dma.hbm_to_vmem [thread:$0]  (%p495_p6), %s939_s29, %s928_s21, %s941_s23, %s931_s28, %s787_s4, %s787_s4, %s788_s9  }
  0x4b PF: > { %p499_p12 = scmp.ge.s32.totalorder %s781_s19, 1  ;;  %p172_p0 = scmp.lt.s32.totalorder %s781_s19, 5 }
  0x4d   : > { %p173_p1 = pnand %p499_p12, %p172_p0 }
  0x4e   : > { %s178_s24 = sand.u32 (!%p173_p1), 1, %s757_s13  }
  0x4f   : > { %176 = sbr.rel (%p173_p1) target bundleno = 516 (0x204), region = 28  ;;  %s966_s12 = sshll.u32 (!%p173_p1), %s178_s24, 4 }
  0x50   : > { %s179_s7 = scalar_lea.sflag (!%p173_p1), [#allocation4], %s178_s24  ;;  %s182_s6 = scalar_lea.vmem (!%p173_p1), [#allocation3], %s966_s12 }
  0x54   : > { %732 = dma.done.wait (%p885_p7), %s179_s7, 256  }
  0x55   : > { %734 = vsyncadd (%p885_p7), %s179_s7, 4294967040  ;;  %s187_s21 = sand.u32 1, %s745_s10  }
  0x56   : > { %s530_s28 = smul.u32 24, %s187_s21  ;;  %s188_s23 = scalar_lea.sflag [#allocation6], %s187_s21 }
  0x58   : > { %s191_s29 = scalar_lea.vmem [#allocation5], %s530_s28 }
  0x59   : > { %736 = dma.done.wait (%p910_p13), %s188_s23, 384  }
  0x5a   : > { %738 = vsyncadd (%p910_p13), %s188_s23, 4294966912  ;;  %s501_s8 = sshll.u32 %s769_s16, 1  ;;  %p503_p7 = scmp.ne.s32.totalorder %s765_s15, 0 }
  0x5b   : > { %p224_p6 = scmp.lt.s32.totalorder %s501_s8, 3 }
  0x5c   : > { %232 = sbr.rel (%p503_p7) target bundleno = 99 (0x63), region = 40 }
  0x5d   : > { %s1060_s8 = smov (!%p224_p6, %s501_s8), 3 }
  0x5e   : > { %s502_s20 = sshll.u32 %s1060_s8, 3 }
  0x5f   : > { %s982_s27 = scalar_lea.vmem %s1029_s2, %s502_s20 }
  0x61   : > { %vm233_vm0 = vcmask 195584   ;;  %v789_v0 = vmov 0.0  }
  0x62   : > { %234 = vst.msk [vmem:[#allocation2] sm:$0xff] %vm233_vm0, %v789_v0  ;;  %235 = vst.msk [vmem:[#allocation2 + $0x8] sm:$0xff] %vm233_vm0, %v789_v0 }
  0x63 PF: > { %v240_v1 = vld [vmem:[%s191_s29 + $0x10] sm:$0xff]  ;;  %vm241_vm1 = vcmask 261120   ;;  %v239_v2 = vld [vmem:[%s191_s29 + $0x8] sm:$0xff]  ;;  %v236_v3 = vld [vmem:[%s182_s6] sm:$0xff]  ;;  %p509_p13 = scmp.eq.s32.totalorder %s765_s15, 1 }
  0x64   : > { %520 = vmatprep.subr.msk.mxu0 %vm241_vm1, %v240_v1  ;;  %526 = vmatprep.mubr.msk.f32.mxu0 %vm241_vm1, %v236_v3  ;;  %v238_v4 = vld [vmem:[%s191_s29] sm:$0xff] }
  0x65   : > { %521 = vmatpush3.xpose.msk.msra.mxu0 %vm241_vm1, %v240_v1  ;;  %v237_v5 = vld [vmem:[%s182_s6 + $0x8] sm:$0xff] }
  0x66   : > { %522 = vmatprep.subr.msk.mxu0 %vm241_vm1, %v239_v2 }
  0x69   : > { %523 = vmatpush3.xpose.msk.msra.mxu0 %vm241_vm1, %v239_v2 }
  0x6a   : > { %524 = vmatprep.subr.msk.mxu0 %vm241_vm1, %v238_v4 }
  0x6d   : > { %525 = vmatpush3.xpose.msk.msra.mxu0 %vm241_vm1, %v238_v4 }
  0x70   : > { %527 = vmatmul.mubr.msk.f32.vlgmr.msra.gmra.mxu0 %vm241_vm1, %v237_v5 }
 0x130   : > { %v528_v6 = vpop.f32.mrf.mxu0 }
 0x131   : > { %v333_v7 = vmul.f32 0.5, %v528_v6 }
 0x132   : > { %v323_v8 = vpop.f32.mrf.mxu0 }
 0x133   : > { %627 = vtanh.f32 %v333_v7  ;;  %v332_v9 = vmul.f32 0.5, %v323_v8 }
 0x135   : > { %629 = vtanh.f32 %v332_v9 }
 0x140   : > { %v628_v10 = vpop.eup %627 }
 0x141   : > { %v337_v11 = vmul.f32 0.5, %v628_v10 }
 0x142   : > { %v630_v12 = vpop.eup %629 }
 0x143   : > { %v339_v13 = vadd.f32 0.5, %v337_v11  ;;  %v336_v14 = vmul.f32 0.5, %v630_v12 }
 0x145   : > { %v342_v15 = vmul.f32 1.442695, %v339_v13  ;;  %v338_v16 = vadd.f32 0.5, %v336_v14 }
 0x147   : > { %631 = vpow2.f32 %v342_v15  ;;  %v340_v17 = vmul.f32 1.442695, %v338_v16 }
 0x149   : > { %633 = vpow2.f32 %v340_v17 }
 0x152   : > { %347 = sbr.rel (%p509_p13) target bundleno = 347 (0x15b), region = 44 }
 0x154   : > { %v632_v18 = vpop.eup %631 }
 0x156   : > { %v634_v19 = vpop.eup %633 }
 0x157   : > { %v348_v20 = vld [vmem:[#allocation2] sm:$0xff]  ;;  %vm352_vm2 = vcmask 195584   ;;  %v349_v21 = vld [vmem:[#allocation2 + $0x8] sm:$0xff] }
 0x158   : > { %v350_v22 = vadd.f32 %v634_v19, %v348_v20  ;;  %v351_v23 = vadd.f32 %v632_v18, %v349_v21 }
 0x15a   : > { %353 = vst.msk [vmem:[#allocation2] sm:$0xff] %vm352_vm2, %v350_v22  ;;  %354 = vst.msk [vmem:[#allocation2 + $0x8] sm:$0xff] %vm352_vm2, %v351_v23 }
 0x15b PF: > { %p510_p2 = scmp.ne.s32.totalorder %s765_s15, 1 }
 0x15c   : > { %s359_s16 = smul.u32 (!%p510_p2), 24, %s765_s15 }
 0x15d   : > { %358 = sbr.rel (%p510_p2) target bundleno = 516 (0x204), region = 48 }
 0x162   : > { %v360_v24 = vlaneseq  ;;  %v362_v26 = vstv %s359_s16  ;;  %v367_v28 = vld [vmem:[#allocation2] sm:$0xff]  ;;  %v368_v29 = vld [vmem:[#allocation2 + $0x8] sm:$0xff]  ;;  %vm371_vm4 = vcmask 195584   ;;  %vm382_vm5 = vcmask 7168  }
 0x164   : > { %v361_v25 = vand.u32 127, %v360_v24 }
 0x166   : > { %v363_v27 = vadd.s32 %v362_v26, %v361_v25 }
 0x168   : > { %vm364_vm3 = vcmp.lt.s32.totalorder %v363_v27, 32 }
 0x169   : > { %v365_v30 = vsel %vm364_vm3, %v634_v19, 0.0  ;;  %v366_v31 = vsel %vm364_vm3, %v632_v18, 0.0 }
 0x16a   : > { %v369_v32 = vadd.f32 %v367_v28, %v365_v30  ;;  %v370_v33 = vadd.f32 %v368_v29, %v366_v31 }
 0x16c   : > { %372 = vst.msk [vmem:[#allocation2] sm:$0xff] %vm371_vm4, %v369_v32  ;;  %373 = vst.msk [vmem:[#allocation2 + $0x8] sm:$0xff] %vm371_vm4, %v370_v33 }
 0x173   : > { %v374_v34 = vld [vmem:[#allocation2] sm:$0xff]  ;;  %v375_v35 = vld [vmem:[#allocation2 + $0x8] sm:$0xff] }
 0x174   : > { %v376_v36 = vsel %vm371_vm4, %v374_v34, 0.0  ;;  %v379_v37 = vsel %vm371_vm4, %v375_v35, 0.0 }
 0x175   : > { %377 = vadd.xlane.f32.xlu0 %v376_v36 }
 0x179   : > { %380 = vadd.xlane.f32.xlu0 %v379_v37 }
 0x1fe   : > { %v378_v38 = vpop.xlane.xlu0 %377 }
 0x1ff   : > { %383 = vst.msk [vmem:[%s982_s27] sm:$0xff] %vm382_vm5, %v378_v38 }
 0x202   : > { %v381_v39 = vpop.xlane.xlu0 %380 }
 0x203   : > { %384 = vst.msk [vmem:[%s982_s27 + $0x8] sm:$0xff] %vm382_vm5, %v381_v39 }
 0x204 PF: > { %s18_s19 = sadd.s32 1, %s781_s19   ;;  %s1039_s5 = sld [smem:[#allocation9_spill]] }
 0x205   : > { %p15_p3 = scmp.ge.s32.totalorder %s18_s19, 6   ;;  %s1040_s25 = sld [smem:[#allocation10_spill]] }
 0x206   : > { %s1041_s9 = smov %s745_s10  ;;  %s1042_s10 = smov %s749_s11 }
 0x207   : > { %s1043_s11 = smov %s895_s30  ;;  %s1044_s12 = smov %s757_s13 }
 0x208   : > { %s1045_s13 = smov %s761_s14  ;;  %s1046_s14 = smov %s898_s3 }
 0x209   : > { %s1047_s15 = smov %s773_s17  ;;  %s1048_s16 = smov %s777_s18 }
 0x20a   : > { %s1049_s17 = smov %s1039_s5  ;;  %17 = sbr.rel (!%p15_p3) target bundleno = 9 (0x9), region = 93 }
 0x20b   : > { %s1050_s18 = smov %s1040_s25 }
 0x20f   :  { %407 = vsyncpa [#allocation4], 1 }
 0x210   :  { %409 = vsyncpa [#allocation4 + $0x1], 1 }
 0x211   :  { %410 = vsyncpa [#allocation6], 1 }
 0x212   :  { %412 = vsyncpa [#allocation6 + $0x1], 1 }

</bundles_post_ra>
